<compile_context>
chip_gen: v7x
topology: tpu7x:2x2x1
jax: 0.10.0
libtpu: 0.0.40
codegen_flags: <defaults>
</compile_context>

<pallas_src>
import math

import jax
import jax.numpy as jnp
from jax.experimental import pallas as pl
from jax.experimental.pallas import tpu as pltpu

_VMEM_WORKING_SET_BUDGET = 24 << 20   # per-step double-buffered working-set target
_VMEM_LIMIT_BYTES = 32 << 20          # scoped-VMEM request; fits v5e/v6e/v7x physical
_ROW_TILE_CAP = 4096                  # fewer, bigger steps (~0.35 us fixed cost/step)
_FASTPATH_MAX_ROWS = 64               # below this, plain XLA fusion beats a custom call


def _round_up(x, m):
    return (x + m - 1) // m * m


def temporal_decay_kernel(d_ref, wtn_ref, bn_ref, out_ref):
    # z_neg = -(d @ W^T + b), computed directly from pre-negated params.
    z_neg = jnp.dot(d_ref[...], wtn_ref[...], preferred_element_type=jnp.float32)
    z_neg = z_neg + bn_ref[...]                        # (tm, hid) + (1, hid)
    # exp(-relu(z)) == min(exp(-z), 1) == min(exp(z_neg), 1); exp overflow -> inf
    # is clamped back to 1, matching exp(-relu(z)) = 1 for z <= 0. exp on EUP.
    out_ref[...] = jnp.minimum(jnp.exp(z_neg), 1.0).astype(out_ref.dtype)


def prepare_temporal_decay_params(W, b):
    """One-time parameter prep (do at init, NOT per forward call).

    W: (hid, input_size), b: (hid,)
    Returns (wt_neg=(input_size, hid), b_neg=(1, hid), hid).
    """
    hid, _ = W.shape
    wt_neg = -W.T
    b_neg = (-b).reshape(1, hid)
    return wt_neg, b_neg, hid


def fuse_temporal_decay_params(prepared):
    """Fuse several prepared decays sharing the same input into one call.

    prepared: list of (wt_neg, b_neg, hid) tuples (same input_size).
    Returns (wt_neg_fused, b_neg_fused, (hid0, hid1, ...)).
    """
    wts, bs, hids = zip(*prepared)
    return (jnp.concatenate(wts, axis=1),
            jnp.concatenate(bs, axis=1),
            tuple(int(h) for h in hids))


def _pick_row_tile(rows, input_size, hid, d_itemsize, out_itemsize):
    # Double-buffered d tile + out tile per step; weight/bias single-buffered.
    bytes_per_row = 2 * (input_size * d_itemsize + hid * out_itemsize)
    weight_bytes = input_size * hid * 4 + hid * 4
    budget = max(_VMEM_WORKING_SET_BUDGET - weight_bytes, 1 << 20)
    tm = min(_ROW_TILE_CAP, max(8, budget // bytes_per_row // 8 * 8))
    tm = min(tm, _round_up(rows, 8))
    # v7x megacore: split across the 2 TensorCores only when each half keeps
    # enough rows (>= ~2K) to amortize the extra step / pipeline fill.
    if tm >= rows and rows >= 4096:
        tm = _round_up(pl.cdiv(rows, 2), 8)
    return tm


def temporal_decay(d, wt_neg, b_neg, hid=None, *, tm=None, out_dtype=None):
    """gamma = exp(-relu(d @ W^T + b)).

    d: (..., input_size); wt_neg/b_neg from prepare_temporal_decay_params (or
    fuse_temporal_decay_params). If `hid` is a tuple (fused params), returns a
    tuple of arrays split per decay head; otherwise returns (..., hid).
    """
    *lead, input_size = d.shape
    hid_total = wt_neg.shape[1]
    rows = math.prod(lead) if lead else 1
    d2 = d.reshape(rows, input_size)
    out_dtype = jnp.dtype(out_dtype) if out_dtype is not None else jnp.dtype(d.dtype)

    if rows <= _FASTPATH_MAX_ROWS:
        # Tiny problem: custom-call launch + pipeline fill exceeds the compute;
        # let XLA fuse the matmul + exp directly.
        z_neg = jnp.dot(d2, wt_neg, preferred_element_type=jnp.float32) + b_neg
        out = jnp.minimum(jnp.exp(z_neg), 1.0).astype(out_dtype)
    else:
        if tm is None:
            tm = _pick_row_tile(rows, input_size, hid_total,
                                jnp.dtype(d.dtype).itemsize, out_dtype.itemsize)
        grid = (pl.cdiv(rows, tm),)

        d_item = jnp.dtype(d.dtype).itemsize
        w_item = jnp.dtype(wt_neg.dtype).itemsize
        cost = pl.CostEstimate(
            flops=2 * rows * input_size * hid_total,
            transcendentals=rows * hid_total,
            bytes_accessed=(rows * input_size * d_item            # d
                            + input_size * hid_total * w_item     # W^T
                            + hid_total * w_item                  # b
                            + rows * hid_total * out_dtype.itemsize),
        )

        out = pl.pallas_call(
            temporal_decay_kernel,
            out_shape=jax.ShapeDtypeStruct((rows, hid_total), out_dtype),
            grid_spec=pltpu.PrefetchScalarGridSpec(
                num_scalar_prefetch=0,
                grid=grid,
                in_specs=[
                    pl.BlockSpec((tm, input_size), lambda i: (i, 0)),
                    # Constant blocks -> no double buffering needed.
                    pl.BlockSpec((input_size, hid_total), lambda i: (0, 0),
                                 pipeline_mode=pl.Buffered(1)),
                    pl.BlockSpec((1, hid_total), lambda i: (0, 0),
                                 pipeline_mode=pl.Buffered(1)),
                ],
                out_specs=pl.BlockSpec((tm, hid_total), lambda i: (i, 0)),
            ),
            compiler_params=pltpu.CompilerParams(
                dimension_semantics=("parallel",),
                vmem_limit_bytes=_VMEM_LIMIT_BYTES),
            cost_estimate=cost,
        )(d2, wt_neg, b_neg)

    if not isinstance(hid, (tuple, list)):
        return out.reshape(*lead, hid_total)
    # Fused twin-decay: split the single output slab per decay head.
    # TODO(synk): if the consumer can take the fused slab directly, skip this split.
    outs, off = [], 0
    for h in hid:
        outs.append(out[:, off:off + h].reshape(*lead, h))
        off += h
    return tuple(outs)


if __name__ == "__main__":
    # Module config: input_size=32, RNN_HID_SIZE=32. rows = T*B = 128 so the
    # Pallas path (not the tiny-problem fast path) is exercised.
    input_size = 32
    rnn_hid = 32
    batch = 16
    seq_len = 8

    key = jax.random.PRNGKey(0)
    k_w, k_b, k_d, k_w2, k_b2 = jax.random.split(key, 5)

    # Deterministic init mirroring reset_parameters: uniform(-stdv, stdv),
    # stdv = 1/sqrt(RNN_HID_SIZE).
    stdv = 1.0 / math.sqrt(rnn_hid)
    W = jax.random.uniform(k_w, (rnn_hid, input_size),
                           minval=-stdv, maxval=stdv, dtype=jnp.float32)
    b = jax.random.uniform(k_b, (rnn_hid,),
                           minval=-stdv, maxval=stdv, dtype=jnp.float32)
    d = jax.random.uniform(k_d, (seq_len, batch, input_size), dtype=jnp.float32)

    # --- Single decay -------------------------------------------------------
    wt_neg, b_neg, hid = prepare_temporal_decay_params(W, b)
    gamma = temporal_decay(d, wt_neg, b_neg, hid)
    gamma = jax.block_until_ready(gamma)

    ref = jnp.exp(-jnp.maximum(jnp.einsum("tbi,hi->tbh", d, W) + b, 0.0))
    assert gamma.shape == (seq_len, batch, rnn_hid)
    assert jnp.allclose(gamma, ref, atol=1e-5, rtol=1e-5), "mismatch vs reference"

    # --- Fused twin decay (BRITS temp_decay_h / temp_decay_x on same d) -----
    W2 = jax.random.uniform(k_w2, (rnn_hid, input_size),
                            minval=-stdv, maxval=stdv, dtype=jnp.float32)
    b2 = jax.random.uniform(k_b2, (rnn_hid,),
                            minval=-stdv, maxval=stdv, dtype=jnp.float32)
    wt_f, b_f, hids = fuse_temporal_decay_params([
        prepare_temporal_decay_params(W, b),
        prepare_temporal_decay_params(W2, b2),
    ])
    g1, g2 = temporal_decay(d, wt_f, b_f, hids)
    jax.block_until_ready((g1, g2))
    ref2 = jnp.exp(-jnp.maximum(jnp.einsum("tbi,hi->tbh", d, W2) + b2, 0.0))
    assert jnp.allclose(g1, ref, atol=1e-5, rtol=1e-5), "fused head 0 mismatch"
    assert jnp.allclose(g2, ref2, atol=1e-5, rtol=1e-5), "fused head 1 mismatch"

    print("KERNEL_OK")
</pallas_src>

<mosaic_0001>
module attributes {stable_mosaic.version = 11 : i64} {
  func.func @temporal_decay_kernel(%arg0: i32, %arg1: memref<128x32xf32, #tpu.memory_space<vmem>>, %arg2: memref<32x32xf32, #tpu.memory_space<vmem>>, %arg3: memref<1x32xf32, #tpu.memory_space<vmem>>, %arg4: memref<128x32xf32, #tpu.memory_space<vmem>>) attributes {dimension_semantics = [#tpu.dimension_semantics<parallel>], iteration_bounds = array<i64: 1>, scalar_prefetch = 0 : i64, scratch_operands = 0 : i64, tpu.core_type = #tpu.core_type<tc>, window_params = [{transform_indices = @transform_0, window_bounds = array<i64: 128, 32>}, {pipeline_mode = #tpu.pipeline_mode<synchronous>, transform_indices = @transform_1, window_bounds = array<i64: 32, 32>}, {pipeline_mode = #tpu.pipeline_mode<synchronous>, transform_indices = @transform_2, window_bounds = array<i64: 1, 32>}, {transform_indices = @transform_3, window_bounds = array<i64: 128, 32>}]} {
    %c0 = arith.constant 0 : index
    %c0_0 = arith.constant 0 : index
    %0 = vector.load %arg1[%c0, %c0_0] : memref<128x32xf32, #tpu.memory_space<vmem>>, vector<128x32xf32>
    %c0_1 = arith.constant 0 : index
    %c0_2 = arith.constant 0 : index
    %1 = vector.load %arg2[%c0_1, %c0_2] : memref<32x32xf32, #tpu.memory_space<vmem>>, vector<32x32xf32>
    %cst = arith.constant dense<0.000000e+00> : vector<128x32xf32>
    %2 = tpu.matmul %0, %1, %cst {dimension_numbers = #tpu.dot_dimension_numbers<[1], [0], [0], [1], [0, 0, 1, 1], [], []>} : vector<128x32xf32>, vector<32x32xf32>, vector<128x32xf32> -> vector<128x32xf32>
    %c0_3 = arith.constant 0 : index
    %c0_4 = arith.constant 0 : index
    %3 = vector.load %arg3[%c0_3, %c0_4] : memref<1x32xf32, #tpu.memory_space<vmem>>, vector<1x32xf32>
    %4 = vector.broadcast %3 : vector<1x32xf32> to vector<128x32xf32>
    %5 = arith.addf %2, %4 : vector<128x32xf32>
    %6 = math.exp %5 : vector<128x32xf32>
    %cst_5 = arith.constant 1.000000e+00 : f32
    %7 = vector.broadcast %cst_5 : f32 to vector<128x32xf32>
    %8 = arith.minimumf %6, %7 : vector<128x32xf32>
    %c0_6 = arith.constant 0 : index
    %c0_7 = arith.constant 0 : index
    %9 = vector.load %arg4[%c0_6, %c0_7] : memref<128x32xf32, #tpu.memory_space<vmem>>, vector<128x32xf32>
    tpu.vector_store %arg4[%c0_6, %c0_7], %8 {strides = array<i32>} : memref<128x32xf32, #tpu.memory_space<vmem>>, vector<128x32xf32>,
    return
  }
  func.func @transform_0(%arg0: i32) -> (i32, i32) {
    %c0_i32 = arith.constant 0 : i32
    %c0_i32_0 = arith.constant 0 : i32
    return %arg0, %c0_i32 : i32, i32
  }
  func.func @transform_1(%arg0: i32) -> (i32, i32) {
    %c0_i32 = arith.constant 0 : i32
    %c0_i32_0 = arith.constant 0 : i32
    %c0_i32_1 = arith.constant 0 : i32
    return %c0_i32, %c0_i32_0 : i32, i32
  }
  func.func @transform_2(%arg0: i32) -> (i32, i32) {
    %c0_i32 = arith.constant 0 : i32
    %c0_i32_0 = arith.constant 0 : i32
    %c0_i32_1 = arith.constant 0 : i32
    return %c0_i32, %c0_i32_0 : i32, i32
  }
  func.func @transform_3(%arg0: i32) -> (i32, i32) {
    %c0_i32 = arith.constant 0 : i32
    %c0_i32_0 = arith.constant 0 : i32
    return %arg0, %c0_i32 : i32, i32
  }
}

</mosaic_0001>

<bundles_post_ra>
// kernel: tpu_custom_call.1
= control target key start
LH: loop header
LB: loop body
LE: loop exit
PB: predicated region body
PF: predicated region fallthrough
CT: control target
= control target key end

     0   :  { %vm41_vm0 = vcmask 261120   ;;  %s579_s1 = inlined_call_operand.vmem [shape: f32[32,32], index: 1, kind: input, shape index: {}]   ;;  %s580_s0 = inlined_call_operand.vmem [shape: f32[128,32], index: 0, kind: input, shape index: {}]   ;;  %s581_s2 = inlined_call_operand.vmem [shape: f32[1,32], index: 2, kind: input, shape index: {}]   ;;  %s582_s3 = inlined_call_operand.vmem [shape: f32[128,32], index: 3, kind: output, shape index: {}]  }
   0x1   :  { %v30_v0 = vld [vmem:[%s579_s1] sm:$0xff]  ;;  %v31_v1 = vld [vmem:[%s579_s1 + $0x8] sm:$0xff]  ;;  %v32_v2 = vld [vmem:[%s579_s1 + $0x10] sm:$0xff] }
   0x2   :  { %v372_v3 = vpack.c.bf16 %v31_v1, %v30_v0  ;;  %v33_v4 = vld [vmem:[%s579_s1 + $0x18] sm:$0xff]  ;;  %v14_v5 = vld [vmem:[%s580_s0] sm:$0xff]  ;;  %v15_v8 = vld [vmem:[%s580_s0 + $0x8] sm:$0xff] }
   0x3   :  { %v22_v6 = vld [vmem:[%s580_s0 + $0x40] sm:$0xff]  ;;  %v376_v7 = vpack.c.bf16 %v33_v4, %v32_v2  ;;  %348 = vmatprep.mubr.msk.f32.mxu0 %vm41_vm0, %v14_v5  ;;  %v23_v9 = vld [vmem:[%s580_s0 + $0x48] sm:$0xff]  ;;  %v16_v10 = vld [vmem:[%s580_s0 + $0x10] sm:$0xff] }
   0x4   :  { %360 = vmatprep.mubr.msk.f32.mxu1 %vm41_vm0, %v22_v6  ;;  %373 = vmatprep.subr.bf16.mxu0 %v372_v3  ;;  %v24_v11 = vld [vmem:[%s580_s0 + $0x50] sm:$0xff]  ;;  %v17_v12 = vld [vmem:[%s580_s0 + $0x18] sm:$0xff]  ;;  %v18_v14 = vld [vmem:[%s580_s0 + $0x20] sm:$0xff] }
   0x5   :  { %380 = vmatprep.subr.bf16.mxu1 %v372_v3  ;;  %375 = vmatpush3.bf16.msra.mxu0 %v372_v3  ;;  %v25_v13 = vld [vmem:[%s580_s0 + $0x58] sm:$0xff]  ;;  %v26_v15 = vld [vmem:[%s580_s0 + $0x60] sm:$0xff]  ;;  %v19_v16 = vld [vmem:[%s580_s0 + $0x28] sm:$0xff] }
   0x6   :  { %382 = vmatpush3.bf16.msra.mxu1 %v372_v3  ;;  %377 = vmatprep.subr.bf16.mxu0 %v376_v7  ;;  %v27_v17 = vld [vmem:[%s580_s0 + $0x68] sm:$0xff]  ;;  %v20_v18 = vld [vmem:[%s580_s0 + $0x30] sm:$0xff]  ;;  %v21_v20 = vld [vmem:[%s580_s0 + $0x38] sm:$0xff] }
   0x7   :  { %381 = vmatprep.subr.bf16.mxu1 %v376_v7  ;;  %v28_v19 = vld [vmem:[%s580_s0 + $0x70] sm:$0xff]  ;;  %v29_v21 = vld [vmem:[%s580_s0 + $0x78] sm:$0xff]  ;;  %v303_v22 = vld [vmem:[%s581_s2] ss:$0 sm:$0xff] }
   0x9   :  { %379 = vmatpush3.bf16.msra.mxu0 %v376_v7 }
   0xa   :  { %383 = vmatpush3.bf16.msra.mxu1 %v376_v7 }
   0xc   :  { %349 = vmatmul.mubr.msk.f32.vlgmr.msra.gmra.mrb[0].mxu0 %vm41_vm0, %v15_v8 }
   0xd   :  { %361 = vmatmul.mubr.msk.f32.vlgmr.msra.gmra.mrb[0].mxu1 %vm41_vm0, %v23_v9  ;;  %351 = vmatprep.mubr.msk.f32.mxu0 %vm41_vm0, %v16_v10 }
   0xe   :  { %363 = vmatprep.mubr.msk.f32.mxu1 %vm41_vm0, %v24_v11 }
  0x10   :  { %352 = vmatmul.mubr.msk.f32.gmra.mrb[2].mxu0 %vm41_vm0, %v17_v12 }
  0x11   :  { %364 = vmatmul.mubr.msk.f32.gmra.mrb[2].mxu1 %vm41_vm0, %v25_v13  ;;  %354 = vmatprep.mubr.msk.f32.mxu0 %vm41_vm0, %v18_v14 }
  0x12   :  { %366 = vmatprep.mubr.msk.f32.mxu1 %vm41_vm0, %v26_v15 }
  0x14   :  { %355 = vmatmul.mubr.msk.f32.gmra.mrb[4].mxu0 %vm41_vm0, %v19_v16 }
  0x15   :  { %367 = vmatmul.mubr.msk.f32.gmra.mrb[4].mxu1 %vm41_vm0, %v27_v17  ;;  %357 = vmatprep.mubr.msk.f32.mxu0 %vm41_vm0, %v20_v18 }
  0x16   :  { %369 = vmatprep.mubr.msk.f32.mxu1 %vm41_vm0, %v28_v19 }
  0x18   :  { %358 = vmatmul.mubr.msk.f32.gmra.mrb[6].mxu0 %vm41_vm0, %v21_v20 }
  0x19   :  { %370 = vmatmul.mubr.msk.f32.gmra.mrb[6].mxu1 %vm41_vm0, %v29_v21 }
  0xdf   :  { %v350_v23 = vpop.f32.mrb[0].mxu0 }
  0xe0   :  { %v362_v24 = vpop.f32.mrb[0].mxu1  ;;  %v162_v25 = vadd.f32 %v350_v23, %v303_v22  ;;  %v156_v27 = vpop.f32.mrb[1].mxu0 }
  0xe1   :  { %v202_v26 = vadd.f32 %v362_v24, %v303_v22  ;;  %v196_v28 = vpop.f32.mrb[1].mxu1  ;;  %v157_v29 = vadd.f32 %v303_v22, %v156_v27 }
  0xe2   :  { %v197_v30 = vadd.f32 %v303_v22, %v196_v28  ;;  %v237_v31 = vmul.f32 1.442695, %v162_v25 }
  0xe3   :  { %v253_v32 = vmul.f32 1.442695, %v202_v26  ;;  %v235_v33 = vmul.f32 1.442695, %v157_v29  ;;  %v353_v35 = vpop.f32.mrb[2].mxu0 }
  0xe4   :  { %v251_v34 = vmul.f32 1.442695, %v197_v30  ;;  %v365_v36 = vpop.f32.mrb[2].mxu1  ;;  %384 = vpow2.f32 %v237_v31  ;;  %v172_v37 = vadd.f32 %v353_v35, %v303_v22  ;;  %v166_v39 = vpop.f32.mrb[3].mxu0 }
  0xe5   :  { %v212_v38 = vadd.f32 %v365_v36, %v303_v22  ;;  %v206_v40 = vpop.f32.mrb[3].mxu1  ;;  %386 = vpow2.f32 %v253_v32  ;;  %v167_v41 = vadd.f32 %v303_v22, %v166_v39 }
  0xe6   :  { %v207_v42 = vadd.f32 %v303_v22, %v206_v40  ;;  %388 = vpow2.f32 %v235_v33  ;;  %v241_v43 = vmul.f32 1.442695, %v172_v37 }
  0xe7   :  { %v257_v44 = vmul.f32 1.442695, %v212_v38  ;;  %390 = vpow2.f32 %v251_v34  ;;  %v239_v45 = vmul.f32 1.442695, %v167_v41  ;;  %v356_v47 = vpop.f32.mrb[4].mxu0 }
  0xe8   :  { %v255_v46 = vmul.f32 1.442695, %v207_v42  ;;  %v368_v48 = vpop.f32.mrb[4].mxu1  ;;  %392 = vpow2.f32 %v241_v43  ;;  %v182_v49 = vadd.f32 %v356_v47, %v303_v22  ;;  %v176_v51 = vpop.f32.mrb[5].mxu0 }
  0xe9   :  { %v222_v50 = vadd.f32 %v368_v48, %v303_v22  ;;  %v216_v52 = vpop.f32.mrb[5].mxu1  ;;  %394 = vpow2.f32 %v257_v44  ;;  %v177_v53 = vadd.f32 %v303_v22, %v176_v51 }
  0xea   :  { %v217_v54 = vadd.f32 %v303_v22, %v216_v52  ;;  %396 = vpow2.f32 %v239_v45  ;;  %v245_v55 = vmul.f32 1.442695, %v182_v49 }
  0xeb   :  { %v261_v56 = vmul.f32 1.442695, %v222_v50  ;;  %398 = vpow2.f32 %v255_v46  ;;  %v243_v57 = vmul.f32 1.442695, %v177_v53  ;;  %v359_v59 = vpop.f32.mrb[6].mxu0 }
  0xec   :  { %v259_v58 = vmul.f32 1.442695, %v217_v54  ;;  %v371_v60 = vpop.f32.mrb[6].mxu1  ;;  %400 = vpow2.f32 %v245_v55  ;;  %v192_v61 = vadd.f32 %v359_v59, %v303_v22  ;;  %v186_v63 = vpop.f32.mrb[7].mxu0 }
  0xed   :  { %v232_v62 = vadd.f32 %v371_v60, %v303_v22  ;;  %v226_v0 = vpop.f32.mrb[7].mxu1  ;;  %402 = vpow2.f32 %v261_v56  ;;  %v187_v1 = vadd.f32 %v303_v22, %v186_v63 }
  0xee   :  { %v227_v2 = vadd.f32 %v303_v22, %v226_v0  ;;  %v385_v3 = vpop.eup %384  ;;  %404 = vpow2.f32 %v243_v57  ;;  %v249_v4 = vmul.f32 1.442695, %v192_v61 }
  0xef   :  { %v265_v5 = vmul.f32 1.442695, %v232_v62  ;;  %v387_v6 = vpop.eup %386  ;;  %v268_v7 = vmin.f32 %v385_v3, 1.0  ;;  %406 = vpow2.f32 %v259_v58  ;;  %v247_v8 = vmul.f32 1.442695, %v187_v1 }
  0xf0   :  { %v263_v9 = vmul.f32 1.442695, %v227_v2  ;;  %v389_v10 = vpop.eup %388  ;;  %v276_v11 = vmin.f32 %v387_v6, 1.0  ;;  %408 = vpow2.f32 %v249_v4 }
  0xf1   :  { %v391_v12 = vpop.eup %390  ;;  %284 = vst.msk [vmem:[%s582_s3 + $0x8] sm:$0xff] %vm41_vm0, %v268_v7  ;;  %v267_v13 = vmin.f32 %v389_v10, 1.0  ;;  %410 = vpow2.f32 %v265_v5 }
  0xf2   :  { %v393_v14 = vpop.eup %392  ;;  %292 = vst.msk [vmem:[%s582_s3 + $0x48] sm:$0xff] %vm41_vm0, %v276_v11  ;;  %v275_v15 = vmin.f32 %v391_v12, 1.0  ;;  %412 = vpow2.f32 %v247_v8 }
  0xf3   :  { %v395_v16 = vpop.eup %394  ;;  %283 = vst.msk [vmem:[%s582_s3] sm:$0xff] %vm41_vm0, %v267_v13  ;;  %v270_v17 = vmin.f32 %v393_v14, 1.0  ;;  %414 = vpow2.f32 %v263_v9 }
  0xf4   :  { %v397_v18 = vpop.eup %396  ;;  %291 = vst.msk [vmem:[%s582_s3 + $0x40] sm:$0xff] %vm41_vm0, %v275_v15  ;;  %v278_v19 = vmin.f32 %v395_v16, 1.0 }
  0xf5   :  { %v399_v20 = vpop.eup %398  ;;  %286 = vst.msk [vmem:[%s582_s3 + $0x18] sm:$0xff] %vm41_vm0, %v270_v17  ;;  %v269_v21 = vmin.f32 %v397_v18, 1.0 }
  0xf6   :  { %v401_v22 = vpop.eup %400  ;;  %294 = vst.msk [vmem:[%s582_s3 + $0x58] sm:$0xff] %vm41_vm0, %v278_v19  ;;  %v277_v23 = vmin.f32 %v399_v20, 1.0 }
  0xf7   :  { %v403_v24 = vpop.eup %402  ;;  %285 = vst.msk [vmem:[%s582_s3 + $0x10] sm:$0xff] %vm41_vm0, %v269_v21  ;;  %v272_v25 = vmin.f32 %v401_v22, 1.0 }
  0xf8   :  { %v405_v26 = vpop.eup %404  ;;  %293 = vst.msk [vmem:[%s582_s3 + $0x50] sm:$0xff] %vm41_vm0, %v277_v23  ;;  %v280_v27 = vmin.f32 %v403_v24, 1.0 }
  0xf9   :  { %v407_v28 = vpop.eup %406  ;;  %288 = vst.msk [vmem:[%s582_s3 + $0x28] sm:$0xff] %vm41_vm0, %v272_v25  ;;  %v271_v29 = vmin.f32 %v405_v26, 1.0 }
  0xfa   :  { %v409_v30 = vpop.eup %408  ;;  %296 = vst.msk [vmem:[%s582_s3 + $0x68] sm:$0xff] %vm41_vm0, %v280_v27  ;;  %v279_v31 = vmin.f32 %v407_v28, 1.0 }
  0xfb   :  { %v411_v32 = vpop.eup %410  ;;  %287 = vst.msk [vmem:[%s582_s3 + $0x20] sm:$0xff] %vm41_vm0, %v271_v29  ;;  %v274_v33 = vmin.f32 %v409_v30, 1.0 }
  0xfc   :  { %v413_v34 = vpop.eup %412  ;;  %295 = vst.msk [vmem:[%s582_s3 + $0x60] sm:$0xff] %vm41_vm0, %v279_v31  ;;  %v282_v35 = vmin.f32 %v411_v32, 1.0 }
  0xfd   :  { %v415_v36 = vpop.eup %414  ;;  %290 = vst.msk [vmem:[%s582_s3 + $0x38] sm:$0xff] %vm41_vm0, %v274_v33  ;;  %v273_v37 = vmin.f32 %v413_v34, 1.0 }
  0xfe   :  { %298 = vst.msk [vmem:[%s582_s3 + $0x78] sm:$0xff] %vm41_vm0, %v282_v35  ;;  %v281_v38 = vmin.f32 %v415_v36, 1.0 }
  0xff   :  { %289 = vst.msk [vmem:[%s582_s3 + $0x30] sm:$0xff] %vm41_vm0, %v273_v37 }
 0x100   :  { %297 = vst.msk [vmem:[%s582_s3 + $0x70] sm:$0xff] %vm41_vm0, %v281_v38 }

</bundles_post_ra>
